<compile_context>
chip_gen: v7x
topology: tpu7x:2x2x1
jax: 0.10.0
libtpu: 0.0.40
codegen_flags: <defaults>
</compile_context>

<pallas_src>
import functools

import jax
import jax.numpy as jnp
from jax import lax
from jax.experimental import pallas as pl
from jax.experimental.pallas import tpu as pltpu

_LANES = 128
_MAX_TILE = 32768        # cap on pixel tile: bounds unrolled vector code size
_VPU_MAX_C = 32          # at/below this channel count: pure f32 VPU path


def _round_up(x, m):
    return (x + m - 1) // m * m


def _cdiv(a, b):
    return -(-a // b)


def _vmem_capacity_bytes():
    try:
        return int(pltpu.get_tpu_info().vmem_capacity_bytes)
    except Exception:
        return 64 * 1024 * 1024          # v7x-safe fallback


def _pick_tile(hw, c, c4, in_itemsize, compute_itemsize):
    """Pick a lane-dense pixel-tile T and the tile count for one image."""
    cap = _vmem_capacity_bytes()
    budget = min(cap // 2, 32 * 1024 * 1024)
    # Steady-state VMEM bytes per pixel column: double-buffered input tile +
    # in-kernel cast copy + f32 h1/h2 temporaries + double-buffered f32 y tile.
    px_bytes = 2 * c * in_itemsize + c * compute_itemsize + (c + c4) * 4 + 2 * 4
    t_target = max(512, min(budget // max(px_bytes, 1), _MAX_TILE))
    t_target = (t_target // _LANES) * _LANES
    hw128 = _round_up(hw, _LANES)
    if t_target >= hw128:
        return hw128, 1
    # Balance tiles so the ragged tail does not waste (nearly) a full tile.
    n = _cdiv(hw128, t_target)
    tile = _round_up(_cdiv(hw128, n), _LANES)
    return tile, _cdiv(hw, tile)


def _mac_rows(w, x):
    """out[o, p] = sum_c w[o, c] * x[c, p] as f32 VPU broadcast-MACs."""
    cin = w.shape[1]
    acc = w[:, 0:1] * x[0:1, :]
    for c in range(1, cin):
        acc = acc + w[:, c:c + 1] * x[c:c + 1, :]
    return acc


def _forward_tile(x_ref, w1_ref, w2_ref, w3_ref, *, use_mxu, compute_dtype):
    """Per-tile compute. Returns (h2 (C4,T) f32, logits (1,T) f32)."""
    if use_mxu:
        x = x_ref[0].astype(compute_dtype)                    # cast in VMEM
        h1 = jnp.maximum(
            jnp.dot(w1_ref[...], x, preferred_element_type=jnp.float32), 0.0)
        h2 = jnp.maximum(
            jnp.dot(w2_ref[...], h1.astype(compute_dtype),
                    preferred_element_type=jnp.float32), 0.0)
    else:
        # Small C: keep everything exact f32 on the VPU (MXU would be <4%
        # utilized and the bf16 casts would cost two full-tile passes).
        x = x_ref[0].astype(jnp.float32)
        h1 = jnp.maximum(_mac_rows(w1_ref[...], x), 0.0)
        h2 = jnp.maximum(_mac_rows(w2_ref[...], h1), 0.0)
    # conv3 has one output channel: VPU broadcast-MAC + tiny sublane reduce.
    logits = jnp.sum(w3_ref[...] * h2, axis=0, keepdims=True)  # (1, T) f32
    return h2, logits


def _localadv_kernel(x_ref, w1_ref, w2_ref, w3_ref, y_ref, *,
                     use_mxu, compute_dtype):
    _, logits = _forward_tile(x_ref, w1_ref, w2_ref, w3_ref,
                              use_mxu=use_mxu, compute_dtype=compute_dtype)
    y_ref[...] = jax.nn.sigmoid(logits)[None].astype(y_ref.dtype)


def _localadv_kernel_ctx(x_ref, w1_ref, w2_ref, w3_ref, y_ref, feat_ref, *,
                         use_mxu, compute_dtype, tile, hw, mask_tail):
    t = pl.program_id(1)

    h2, logits = _forward_tile(x_ref, w1_ref, w2_ref, w3_ref,
                               use_mxu=use_mxu, compute_dtype=compute_dtype)
    y_ref[...] = jax.nn.sigmoid(logits)[None].astype(y_ref.dtype)

    if mask_tail:
        # The last pixel block is partial: its out-of-bounds lanes hold
        # unspecified data, so mask them out of the avg-pool accumulation.
        col = t * tile + lax.broadcasted_iota(jnp.int32, (1, tile), 1)
        h2 = jnp.where(col < hw, h2, 0.0)

    partial = jnp.sum(h2, axis=1, keepdims=True)[None]         # (1, C4, 1)

    # feat block index ignores t -> resident accumulator across the tile axis.
    @pl.when(t == 0)
    def _():
        feat_ref[...] = jnp.zeros_like(feat_ref)

    feat_ref[...] += partial

    @pl.when(t == pl.num_programs(1) - 1)
    def _():
        feat_ref[...] *= jnp.float32(1.0 / hw)


@functools.partial(jax.jit,
                   static_argnames=("context", "compute_dtype", "out_dtype"))
def local_adv_forward(x_nchw, w1, w2, w3, *, context=False,
                      compute_dtype=jnp.float32, out_dtype=jnp.float32):
    """Forward pass of LocalAdv.

    Args:
      x_nchw: (N, C, H, W) input (PyTorch NCHW convention).
      w1: (C, C)    = conv1.weight[:, :, 0, 0]   (out, in)
      w2: (C//4, C) = conv2.weight[:, :, 0, 0]
      w3: (1, C//4) = conv3.weight[:, :, 0, 0]
      context: if True, also return the global-avg-pooled conv2 features.
      compute_dtype: matmul input dtype for the MXU path (C > 32); the small-C
        VPU path is always exact f32. Accumulation is always f32.
      out_dtype: dtype of the sigmoid map (sigmoid computed in f32).
    """
    N, C, H, W = x_nchw.shape
    C4 = w2.shape[0]
    HW = H * W

    use_mxu = C > _VPU_MAX_C
    w_dtype = jnp.dtype(compute_dtype) if use_mxu else jnp.dtype(jnp.float32)

    # NCHW -> (N, C, HW): metadata-only reshape. No cast, no pad in HBM; the
    # kernel reads the raw pixels and handles the ragged tail itself.
    x = x_nchw.reshape(N, C, HW)

    T, num_tiles = _pick_tile(HW, C, C4,
                              jnp.dtype(x.dtype).itemsize,
                              jnp.dtype(w_dtype).itemsize)

    w1c = w1.astype(w_dtype)                         # (C,  C)
    w2c = w2.astype(w_dtype)                         # (C4, C)
    w3c = w3.reshape(C4, 1).astype(jnp.float32)      # conv3 runs on VPU in f32

    grid = (N, num_tiles)
    in_specs = [
        pl.BlockSpec((1, C, T), lambda b, t: (b, 0, t)),
        pl.BlockSpec((C, C), lambda b, t: (0, 0)),
        pl.BlockSpec((C4, C), lambda b, t: (0, 0)),
        pl.BlockSpec((C4, 1), lambda b, t: (0, 0)),
    ]
    y_spec = pl.BlockSpec((1, 1, T), lambda b, t: (b, 0, t))
    y_shape = jax.ShapeDtypeStruct((N, 1, HW), jnp.dtype(out_dtype))

    vmem_cap = _vmem_capacity_bytes()
    vmem_limit = int(min(vmem_cap - (4 << 20), 100 << 20))

    if context:
        kernel = functools.partial(
            _localadv_kernel_ctx, use_mxu=use_mxu, compute_dtype=compute_dtype,
            tile=T, hw=HW, mask_tail=(num_tiles * T != HW))
        y_flat, feat = pl.pallas_call(
            kernel,
            out_shape=(
                y_shape,
                jax.ShapeDtypeStruct((N, C4, 1), jnp.float32),
            ),
            grid_spec=pltpu.PrefetchScalarGridSpec(
                num_scalar_prefetch=0,
                grid=grid,
                in_specs=in_specs,
                out_specs=[
                    y_spec,
                    pl.BlockSpec((1, C4, 1), lambda b, t: (b, 0, 0)),
                ],
            ),
            compiler_params=pltpu.CompilerParams(
                dimension_semantics=("parallel", "arbitrary"),
                vmem_limit_bytes=vmem_limit),
        )(x, w1c, w2c, w3c)
        y = y_flat.reshape(N, 1, H, W)
        return y, feat.reshape(N, C4, 1, 1)

    kernel = functools.partial(_localadv_kernel, use_mxu=use_mxu,
                               compute_dtype=compute_dtype)
    y_flat = pl.pallas_call(
        kernel,
        out_shape=y_shape,
        grid_spec=pltpu.PrefetchScalarGridSpec(
            num_scalar_prefetch=0,
            grid=grid,
            in_specs=in_specs,
            out_specs=y_spec,
        ),
        compiler_params=pltpu.CompilerParams(
            dimension_semantics=("parallel", "parallel"),
            vmem_limit_bytes=vmem_limit),
    )(x, w1c, w2c, w3c)
    return y_flat.reshape(N, 1, H, W)


def _reference_forward(x_nchw, w1, w2, w3, context=False,
                       compute_dtype=jnp.float32):
    """Pure-JAX reference matching the PyTorch module."""
    N, C, H, W = x_nchw.shape
    cd = jnp.dtype(compute_dtype)
    prec = "highest" if cd == jnp.dtype(jnp.float32) else None
    x = x_nchw.reshape(N, C, H * W).astype(cd)
    h1 = jax.nn.relu(jnp.einsum("oc,ncp->nop", w1.astype(cd), x,
                                preferred_element_type=jnp.float32,
                                precision=prec))
    h2 = jax.nn.relu(jnp.einsum("oc,ncp->nop", w2.astype(cd), h1.astype(cd),
                                preferred_element_type=jnp.float32,
                                precision=prec))
    logits = jnp.einsum("oc,ncp->nop", w3.astype(jnp.float32), h2,
                        preferred_element_type=jnp.float32,
                        precision="highest")
    y = jax.nn.sigmoid(logits).reshape(N, 1, H, W)
    if context:
        feat = jnp.mean(h2, axis=2).reshape(N, -1, 1, 1)
        return y, feat
    return y


def _check(x, w1, w2, w3, compute_dtype, atol):
    N, C, H, W = x.shape
    C4 = w2.shape[0]

    y = local_adv_forward(x, w1, w2, w3, context=False,
                          compute_dtype=compute_dtype)
    y = jax.block_until_ready(y)
    y_ref = _reference_forward(x, w1, w2, w3, context=False,
                               compute_dtype=compute_dtype)
    assert y.shape == (N, 1, H, W)
    assert jnp.allclose(y, y_ref, atol=atol, rtol=1e-3), \
        float(jnp.max(jnp.abs(y - y_ref)))

    y_c, feat = local_adv_forward(x, w1, w2, w3, context=True,
                                  compute_dtype=compute_dtype)
    jax.block_until_ready((y_c, feat))
    y_c_ref, feat_ref = _reference_forward(x, w1, w2, w3, context=True,
                                           compute_dtype=compute_dtype)
    assert y_c.shape == (N, 1, H, W) and feat.shape == (N, C4, 1, 1)
    assert jnp.allclose(y_c, y_c_ref, atol=atol, rtol=1e-3), \
        float(jnp.max(jnp.abs(y_c - y_c_ref)))
    assert jnp.allclose(feat, feat_ref, atol=atol, rtol=1e-3), \
        float(jnp.max(jnp.abs(feat - feat_ref)))


if __name__ == "__main__":
    key = jax.random.PRNGKey(0)
    k_x, k_w1, k_w2, k_w3 = jax.random.split(key, 4)

    # ---- small-C f32 VPU path: lane-aligned and ragged spatial sizes -------
    N, C = 2, 8
    C4 = C // 4
    w1 = 0.1 * jax.random.normal(k_w1, (C, C), dtype=jnp.float32)
    w2 = 0.1 * jax.random.normal(k_w2, (C4, C), dtype=jnp.float32)
    w3 = 0.3 * jax.random.normal(k_w3, (1, C4), dtype=jnp.float32)
    for (H, W) in ((16, 16), (10, 10)):          # HW=256 and ragged HW=100
        x = jax.random.normal(k_x, (N, C, H, W), dtype=jnp.float32)
        _check(x, w1, w2, w3, compute_dtype=jnp.float32, atol=2e-5)

    # ---- large-C MXU path (bf16 matmul inputs, f32 accumulation) -----------
    N, C, H, W = 1, 64, 16, 16
    C4 = C // 4
    w1 = 0.05 * jax.random.normal(k_w1, (C, C), dtype=jnp.float32)
    w2 = 0.05 * jax.random.normal(k_w2, (C4, C), dtype=jnp.float32)
    w3 = 0.1 * jax.random.normal(k_w3, (1, C4), dtype=jnp.float32)
    x = jax.random.normal(k_x, (N, C, H, W), dtype=jnp.float32)
    _check(x, w1, w2, w3, compute_dtype=jnp.bfloat16, atol=1e-4)

    print("KERNEL_OK")
</pallas_src>

<mosaic_0001>
module attributes {stable_mosaic.version = 11 : i64} {
  func.func @_localadv_kernel(%arg0: i32, %arg1: i32, %arg2: memref<1x8x256xf32, #tpu.memory_space<vmem>>, %arg3: memref<8x8xf32, #tpu.memory_space<vmem>>, %arg4: memref<2x8xf32, #tpu.memory_space<vmem>>, %arg5: memref<2x1xf32, #tpu.memory_space<vmem>>, %arg6: memref<1x1x256xf32, #tpu.memory_space<vmem>>) attributes {dimension_semantics = [#tpu.dimension_semantics<parallel>, #tpu.dimension_semantics<parallel>], iteration_bounds = array<i64: 2, 1>, scalar_prefetch = 0 : i64, scratch_operands = 0 : i64, tpu.core_type = #tpu.core_type<tc>, window_params = [{transform_indices = @transform_0, window_bounds = array<i64: 1, 8, 256>}, {pipeline_mode = #tpu.pipeline_mode<synchronous>, transform_indices = @transform_1, window_bounds = array<i64: 8, 8>}, {pipeline_mode = #tpu.pipeline_mode<synchronous>, transform_indices = @transform_2, window_bounds = array<i64: 2, 8>}, {pipeline_mode = #tpu.pipeline_mode<synchronous>, transform_indices = @transform_3, window_bounds = array<i64: 2, 1>}, {transform_indices = @transform_4, window_bounds = array<i64: 1, 1, 256>}]} {
    %c0 = arith.constant 0 : index
    %c0_0 = arith.constant 0 : index
    %c0_1 = arith.constant 0 : index
    %0 = vector.load %arg2[%c0, %c0_0, %c0_1] : memref<1x8x256xf32, #tpu.memory_space<vmem>>, vector<1x8x256xf32>
    %1 = vector.shape_cast %0 : vector<1x8x256xf32> to vector<8x256xf32>
    %c0_2 = arith.constant 0 : index
    %c0_3 = arith.constant 0 : index
    %2 = vector.load %arg3[%c0_2, %c0_3] : memref<8x8xf32, #tpu.memory_space<vmem>>, vector<8x8xf32>
    %3 = vector.extract_strided_slice %2 {offsets = [0, 0], sizes = [8, 1], strides = [1, 1]} : vector<8x8xf32> to vector<8x1xf32>
    %4 = vector.extract_strided_slice %1 {offsets = [0, 0], sizes = [1, 256], strides = [1, 1]} : vector<8x256xf32> to vector<1x256xf32>
    %5 = vector.broadcast %3 : vector<8x1xf32> to vector<8x256xf32>
    %6 = vector.broadcast %4 : vector<1x256xf32> to vector<8x256xf32>
    %7 = arith.mulf %5, %6 : vector<8x256xf32>
    %8 = vector.extract_strided_slice %2 {offsets = [0, 1], sizes = [8, 1], strides = [1, 1]} : vector<8x8xf32> to vector<8x1xf32>
    %9 = vector.extract_strided_slice %1 {offsets = [1, 0], sizes = [1, 256], strides = [1, 1]} : vector<8x256xf32> to vector<1x256xf32>
    %10 = vector.broadcast %8 : vector<8x1xf32> to vector<8x256xf32>
    %11 = vector.broadcast %9 : vector<1x256xf32> to vector<8x256xf32>
    %12 = arith.mulf %10, %11 : vector<8x256xf32>
    %13 = arith.addf %7, %12 : vector<8x256xf32>
    %14 = vector.extract_strided_slice %2 {offsets = [0, 2], sizes = [8, 1], strides = [1, 1]} : vector<8x8xf32> to vector<8x1xf32>
    %15 = vector.extract_strided_slice %1 {offsets = [2, 0], sizes = [1, 256], strides = [1, 1]} : vector<8x256xf32> to vector<1x256xf32>
    %16 = vector.broadcast %14 : vector<8x1xf32> to vector<8x256xf32>
    %17 = vector.broadcast %15 : vector<1x256xf32> to vector<8x256xf32>
    %18 = arith.mulf %16, %17 : vector<8x256xf32>
    %19 = arith.addf %13, %18 : vector<8x256xf32>
    %20 = vector.extract_strided_slice %2 {offsets = [0, 3], sizes = [8, 1], strides = [1, 1]} : vector<8x8xf32> to vector<8x1xf32>
    %21 = vector.extract_strided_slice %1 {offsets = [3, 0], sizes = [1, 256], strides = [1, 1]} : vector<8x256xf32> to vector<1x256xf32>
    %22 = vector.broadcast %20 : vector<8x1xf32> to vector<8x256xf32>
    %23 = vector.broadcast %21 : vector<1x256xf32> to vector<8x256xf32>
    %24 = arith.mulf %22, %23 : vector<8x256xf32>
    %25 = arith.addf %19, %24 : vector<8x256xf32>
    %26 = vector.extract_strided_slice %2 {offsets = [0, 4], sizes = [8, 1], strides = [1, 1]} : vector<8x8xf32> to vector<8x1xf32>
    %27 = vector.extract_strided_slice %1 {offsets = [4, 0], sizes = [1, 256], strides = [1, 1]} : vector<8x256xf32> to vector<1x256xf32>
    %28 = vector.broadcast %26 : vector<8x1xf32> to vector<8x256xf32>
    %29 = vector.broadcast %27 : vector<1x256xf32> to vector<8x256xf32>
    %30 = arith.mulf %28, %29 : vector<8x256xf32>
    %31 = arith.addf %25, %30 : vector<8x256xf32>
    %32 = vector.extract_strided_slice %2 {offsets = [0, 5], sizes = [8, 1], strides = [1, 1]} : vector<8x8xf32> to vector<8x1xf32>
    %33 = vector.extract_strided_slice %1 {offsets = [5, 0], sizes = [1, 256], strides = [1, 1]} : vector<8x256xf32> to vector<1x256xf32>
    %34 = vector.broadcast %32 : vector<8x1xf32> to vector<8x256xf32>
    %35 = vector.broadcast %33 : vector<1x256xf32> to vector<8x256xf32>
    %36 = arith.mulf %34, %35 : vector<8x256xf32>
    %37 = arith.addf %31, %36 : vector<8x256xf32>
    %38 = vector.extract_strided_slice %2 {offsets = [0, 6], sizes = [8, 1], strides = [1, 1]} : vector<8x8xf32> to vector<8x1xf32>
    %39 = vector.extract_strided_slice %1 {offsets = [6, 0], sizes = [1, 256], strides = [1, 1]} : vector<8x256xf32> to vector<1x256xf32>
    %40 = vector.broadcast %38 : vector<8x1xf32> to vector<8x256xf32>
    %41 = vector.broadcast %39 : vector<1x256xf32> to vector<8x256xf32>
    %42 = arith.mulf %40, %41 : vector<8x256xf32>
    %43 = arith.addf %37, %42 : vector<8x256xf32>
    %44 = vector.extract_strided_slice %2 {offsets = [0, 7], sizes = [8, 1], strides = [1, 1]} : vector<8x8xf32> to vector<8x1xf32>
    %45 = vector.extract_strided_slice %1 {offsets = [7, 0], sizes = [1, 256], strides = [1, 1]} : vector<8x256xf32> to vector<1x256xf32>
    %46 = vector.broadcast %44 : vector<8x1xf32> to vector<8x256xf32>
    %47 = vector.broadcast %45 : vector<1x256xf32> to vector<8x256xf32>
    %48 = arith.mulf %46, %47 : vector<8x256xf32>
    %49 = arith.addf %43, %48 : vector<8x256xf32>
    %cst = arith.constant 0.000000e+00 : f32
    %50 = vector.broadcast %cst : f32 to vector<8x256xf32>
    %51 = arith.maximumf %49, %50 : vector<8x256xf32>
    %c0_4 = arith.constant 0 : index
    %c0_5 = arith.constant 0 : index
    %52 = vector.load %arg4[%c0_4, %c0_5] : memref<2x8xf32, #tpu.memory_space<vmem>>, vector<2x8xf32>
    %53 = vector.extract_strided_slice %52 {offsets = [0, 0], sizes = [2, 1], strides = [1, 1]} : vector<2x8xf32> to vector<2x1xf32>
    %54 = vector.extract_strided_slice %51 {offsets = [0, 0], sizes = [1, 256], strides = [1, 1]} : vector<8x256xf32> to vector<1x256xf32>
    %55 = vector.broadcast %53 : vector<2x1xf32> to vector<2x256xf32>
    %56 = vector.broadcast %54 : vector<1x256xf32> to vector<2x256xf32>
    %57 = arith.mulf %55, %56 : vector<2x256xf32>
    %58 = vector.extract_strided_slice %52 {offsets = [0, 1], sizes = [2, 1], strides = [1, 1]} : vector<2x8xf32> to vector<2x1xf32>
    %59 = vector.extract_strided_slice %51 {offsets = [1, 0], sizes = [1, 256], strides = [1, 1]} : vector<8x256xf32> to vector<1x256xf32>
    %60 = vector.broadcast %58 : vector<2x1xf32> to vector<2x256xf32>
    %61 = vector.broadcast %59 : vector<1x256xf32> to vector<2x256xf32>
    %62 = arith.mulf %60, %61 : vector<2x256xf32>
    %63 = arith.addf %57, %62 : vector<2x256xf32>
    %64 = vector.extract_strided_slice %52 {offsets = [0, 2], sizes = [2, 1], strides = [1, 1]} : vector<2x8xf32> to vector<2x1xf32>
    %65 = vector.extract_strided_slice %51 {offsets = [2, 0], sizes = [1, 256], strides = [1, 1]} : vector<8x256xf32> to vector<1x256xf32>
    %66 = vector.broadcast %64 : vector<2x1xf32> to vector<2x256xf32>
    %67 = vector.broadcast %65 : vector<1x256xf32> to vector<2x256xf32>
    %68 = arith.mulf %66, %67 : vector<2x256xf32>
    %69 = arith.addf %63, %68 : vector<2x256xf32>
    %70 = vector.extract_strided_slice %52 {offsets = [0, 3], sizes = [2, 1], strides = [1, 1]} : vector<2x8xf32> to vector<2x1xf32>
    %71 = vector.extract_strided_slice %51 {offsets = [3, 0], sizes = [1, 256], strides = [1, 1]} : vector<8x256xf32> to vector<1x256xf32>
    %72 = vector.broadcast %70 : vector<2x1xf32> to vector<2x256xf32>
    %73 = vector.broadcast %71 : vector<1x256xf32> to vector<2x256xf32>
    %74 = arith.mulf %72, %73 : vector<2x256xf32>
    %75 = arith.addf %69, %74 : vector<2x256xf32>
    %76 = vector.extract_strided_slice %52 {offsets = [0, 4], sizes = [2, 1], strides = [1, 1]} : vector<2x8xf32> to vector<2x1xf32>
    %77 = vector.extract_strided_slice %51 {offsets = [4, 0], sizes = [1, 256], strides = [1, 1]} : vector<8x256xf32> to vector<1x256xf32>
    %78 = vector.broadcast %76 : vector<2x1xf32> to vector<2x256xf32>
    %79 = vector.broadcast %77 : vector<1x256xf32> to vector<2x256xf32>
    %80 = arith.mulf %78, %79 : vector<2x256xf32>
    %81 = arith.addf %75, %80 : vector<2x256xf32>
    %82 = vector.extract_strided_slice %52 {offsets = [0, 5], sizes = [2, 1], strides = [1, 1]} : vector<2x8xf32> to vector<2x1xf32>
    %83 = vector.extract_strided_slice %51 {offsets = [5, 0], sizes = [1, 256], strides = [1, 1]} : vector<8x256xf32> to vector<1x256xf32>
    %84 = vector.broadcast %82 : vector<2x1xf32> to vector<2x256xf32>
    %85 = vector.broadcast %83 : vector<1x256xf32> to vector<2x256xf32>
    %86 = arith.mulf %84, %85 : vector<2x256xf32>
    %87 = arith.addf %81, %86 : vector<2x256xf32>
    %88 = vector.extract_strided_slice %52 {offsets = [0, 6], sizes = [2, 1], strides = [1, 1]} : vector<2x8xf32> to vector<2x1xf32>
    %89 = vector.extract_strided_slice %51 {offsets = [6, 0], sizes = [1, 256], strides = [1, 1]} : vector<8x256xf32> to vector<1x256xf32>
    %90 = vector.broadcast %88 : vector<2x1xf32> to vector<2x256xf32>
    %91 = vector.broadcast %89 : vector<1x256xf32> to vector<2x256xf32>
    %92 = arith.mulf %90, %91 : vector<2x256xf32>
    %93 = arith.addf %87, %92 : vector<2x256xf32>
    %94 = vector.extract_strided_slice %52 {offsets = [0, 7], sizes = [2, 1], strides = [1, 1]} : vector<2x8xf32> to vector<2x1xf32>
    %95 = vector.extract_strided_slice %51 {offsets = [7, 0], sizes = [1, 256], strides = [1, 1]} : vector<8x256xf32> to vector<1x256xf32>
    %96 = vector.broadcast %94 : vector<2x1xf32> to vector<2x256xf32>
    %97 = vector.broadcast %95 : vector<1x256xf32> to vector<2x256xf32>
    %98 = arith.mulf %96, %97 : vector<2x256xf32>
    %99 = arith.addf %93, %98 : vector<2x256xf32>
    %cst_6 = arith.constant 0.000000e+00 : f32
    %100 = vector.broadcast %cst_6 : f32 to vector<2x256xf32>
    %101 = arith.maximumf %99, %100 : vector<2x256xf32>
    %c0_7 = arith.constant 0 : index
    %c0_8 = arith.constant 0 : index
    %102 = vector.load %arg5[%c0_7, %c0_8] : memref<2x1xf32, #tpu.memory_space<vmem>>, vector<2x1xf32>
    %103 = vector.broadcast %102 : vector<2x1xf32> to vector<2x256xf32>
    %104 = arith.mulf %103, %101 : vector<2x256xf32>
    %cst_9 = arith.constant dense<0.000000e+00> : vector<256xf32>
    %105 = vector.multi_reduction <add>, %104, %cst_9 [0] : vector<2x256xf32> to vector<256xf32>
    %106 = vector.shape_cast %105 : vector<256xf32> to vector<1x256xf32>
    %107 = arith.negf %106 : vector<1x256xf32>
    %108 = math.exp %107 : vector<1x256xf32>
    %cst_10 = arith.constant 1.000000e+00 : f32
    %109 = vector.broadcast %cst_10 : f32 to vector<1x256xf32>
    %110 = arith.addf %109, %108 : vector<1x256xf32>
    %111 = arith.divf %109, %110 : vector<1x256xf32>
    %112 = vector.shape_cast %111 : vector<1x256xf32> to vector<1x1x256xf32>
    %c0_11 = arith.constant 0 : index
    %c0_12 = arith.constant 0 : index
    %c0_13 = arith.constant 0 : index
    %113 = vector.load %arg6[%c0_11, %c0_12, %c0_13] : memref<1x1x256xf32, #tpu.memory_space<vmem>>, vector<1x1x256xf32>
    tpu.vector_store %arg6[%c0_11, %c0_12, %c0_13], %112 {strides = array<i32>} : memref<1x1x256xf32, #tpu.memory_space<vmem>>, vector<1x1x256xf32>,
    return
  }
  func.func @transform_0(%arg0: i32, %arg1: i32) -> (i32, i32, i32) {
    %c0_i32 = arith.constant 0 : i32
    %c0_i32_0 = arith.constant 0 : i32
    return %arg0, %c0_i32, %arg1 : i32, i32, i32
  }
  func.func @transform_1(%arg0: i32, %arg1: i32) -> (i32, i32) {
    %c0_i32 = arith.constant 0 : i32
    %c0_i32_0 = arith.constant 0 : i32
    %c0_i32_1 = arith.constant 0 : i32
    return %c0_i32, %c0_i32_0 : i32, i32
  }
  func.func @transform_2(%arg0: i32, %arg1: i32) -> (i32, i32) {
    %c0_i32 = arith.constant 0 : i32
    %c0_i32_0 = arith.constant 0 : i32
    %c0_i32_1 = arith.constant 0 : i32
    return %c0_i32, %c0_i32_0 : i32, i32
  }
  func.func @transform_3(%arg0: i32, %arg1: i32) -> (i32, i32) {
    %c0_i32 = arith.constant 0 : i32
    %c0_i32_0 = arith.constant 0 : i32
    %c0_i32_1 = arith.constant 0 : i32
    return %c0_i32, %c0_i32_0 : i32, i32
  }
  func.func @transform_4(%arg0: i32, %arg1: i32) -> (i32, i32, i32) {
    %c0_i32 = arith.constant 0 : i32
    %c0_i32_0 = arith.constant 0 : i32
    return %arg0, %c0_i32, %arg1 : i32, i32, i32
  }
}

</mosaic_0001>

<bundles_post_ra>
// kernel: local_adv_forward.1
= control target key start
LH: loop header
LB: loop body
LE: loop exit
PB: predicated region body
PF: predicated region fallthrough
CT: control target
= control target key end

     0   :  { %s766_s15 = smov 0   ;;  %s768_s16 = smov 0   ;;  %s877_s0 = inlined_call_operand.vmem [shape: f32[2,8,256], index: 0, kind: input, shape index: {}]   ;;  %s878_s1 = inlined_call_operand.vmem [shape: f32[8,8], index: 1, kind: input, shape index: {}]   ;;  %s879_s2 = inlined_call_operand.vmem [shape: f32[2,8], index: 2, kind: input, shape index: {}]   ;;  %s880_s3 = inlined_call_operand.vmem [shape: f32[2,1], index: 3, kind: input, shape index: {}]   ;;  %s881_s4 = inlined_call_operand.vmem [shape: f32[2,1,256], index: 4, kind: output, shape index: {}]  }
   0x1   :  { %s770_s17 = smov 0  }
   0x2 LB: > { %s26_s18 = sadd.s32 1, %s726_s16  ;;  %p640_p0 = scmp.ge.s32.totalorder %s730_s17, 1  ;;  %s730_s17 = sphi %s770_s17, %s14_s17   ;;  %s726_s16 = sphi %s768_s16, %s883_s16   ;;  %s722_s15 = sphi %s766_s15, %s882_s15  }
   0x3   : > { %p28_p1 = scmp.ge.s32.totalorder %s26_s18, 2  ;;  %p183_p2 = scmp.lt.s32.totalorder %s730_s17, 3 }
   0x5   : > { %s885_s18 = smov (%p28_p1, %s26_s18), 0  ;;  %p184_p3 = pnand %p640_p0, %p183_p2 }
   0x6   : > { %v237_v0 = vld [vmem:[%s878_s1] sm:$0xff] (!%p184_p3)  ;;  %v732_v1 = vmov (!%p184_p3), 2   ;;  %v733_v2 = vmov (!%p184_p3), 0   ;;  %v734_v3 = vmov (!%p184_p3), 3   ;;  %v735_v4 = vmov (!%p184_p3), 1   ;;  %p217_p4 = scmp.lt.s32.totalorder (!%p184_p3), %s722_s15, 1 }
   0x7   : > { %187 = sbr.rel (%p184_p3) target bundleno = 236 (0xec), region = 36  ;;  %684 = vset.pattern.permute.xlu1 (!%p184_p3), %v732_v1  ;;  %682 = vset.pattern.permute.xlu0 (!%p184_p3), %v733_v2  ;;  %v736_v5 = vmov (!%p184_p3), 4   ;;  %v737_v6 = vmov (!%p184_p3), 5   ;;  %v367_v7 = vld [vmem:[%s879_s2] sm:$0x3] (!%p184_p3)  ;;  %v738_v8 = vmov (!%p184_p3), 6   ;;  %v243_v11 = vlaneseq (!%p184_p3) }
   0x8   : > { %270 = vperm.xlu1 (!%p184_p3), %684, %v237_v0   ;;  %240 = vperm.xlu0 (!%p184_p3), %682, %v237_v0   ;;  %v739_v9 = vmov (!%p184_p3), 7   ;;  %v497_v10 = vld [vmem:[%s880_s3] sm:$0x3] (!%p184_p3)  ;;  %vm505_vm0 = vcmask (!%p184_p3), 1041408  }
   0x9   : > { %v801_v12 = vshrl.u32 (!%p184_p3), %v243_v11, 7  ;;  %vm552_vm1 = vcmp.lt.s32.totalorder (!%p184_p3), %v243_v11, 256 }
   0xb   : > { %v807_v13 = vsub.s32 (!%p184_p3), 0, %v801_v12  ;;  %v810_v14 = vsub.s32 (!%p184_p3), 1, %v801_v12  ;;  %v813_v17 = vsub.s32 (!%p184_p3), 2, %v801_v12  ;;  %v818_v22 = vsub.s32 (!%p184_p3), 3, %v801_v12 }
   0xc   : > { %685 = vset.pattern.permute.xlu1 (!%p184_p3), %v734_v3  ;;  %683 = vset.pattern.permute.xlu0 (!%p184_p3), %v735_v4  ;;  %v823_v25 = vsub.s32 (!%p184_p3), 4, %v801_v12  ;;  %v828_v32 = vsub.s32 (!%p184_p3), 5, %v801_v12  ;;  %v837_v45 = vsub.s32 (!%p184_p3), 6, %v801_v12  ;;  %v840_v56 = vsub.s32 (!%p184_p3), 7, %v801_v12 }
   0xd   : > { %286 = vperm.xlu1 (!%p184_p3), %685, %v237_v0   ;;  %254 = vperm.xlu0 (!%p184_p3), %683, %v237_v0  }
   0xe   : > { %s887_s15 = smov (!%p217_p4, %s722_s15), 1 }
   0xf   : > { %s648_s25 = sshll.u32 %s887_s15, 4  ;;  %s643_s29 = sshll.u32 %s887_s15, 1 }
  0x10   : > { %s224_s28 = scalar_lea.vmem %s877_s0, %s648_s25  ;;  %s233_s6 = scalar_lea.vmem %s881_s4, %s643_s29 }
  0x11   : > { %686 = vset.pattern.permute.xlu1 %v736_v5  ;;  %687 = vset.pattern.permute.xlu0 %v737_v6  ;;  %v235_v15 = vld [vmem:[%s224_s28] sm:$0xff]  ;;  %v236_v16 = vld [vmem:[%s224_s28 + $0x8] sm:$0xff] }
  0x12   : > { %302 = vperm.xlu1 %686, %v237_v0   ;;  %318 = vperm.xlu0 %687, %v237_v0   ;;  %v246_v20 = vrot.slane %v235_v15, %v807_v13  ;;  %v250_v21 = vrot.slane %v236_v16, %v807_v13  ;;  %v260_v23 = vrot.slane %v235_v15, %v810_v14 }
  0x13   : > { %v264_v24 = vrot.slane %v236_v16, %v810_v14  ;;  %v276_v26 = vrot.slane %v235_v15, %v813_v17  ;;  %v280_v27 = vrot.slane %v236_v16, %v813_v17  ;;  %v292_v33 = vrot.slane %v235_v15, %v818_v22 }
  0x14   : > { %v296_v34 = vrot.slane %v236_v16, %v818_v22  ;;  %v308_v37 = vrot.slane %v235_v15, %v823_v25  ;;  %v312_v38 = vrot.slane %v236_v16, %v823_v25  ;;  %v324_v43 = vrot.slane %v235_v15, %v828_v32 }
  0x15   : > { %v328_v44 = vrot.slane %v236_v16, %v828_v32  ;;  %v340_v59 = vrot.slane %v235_v15, %v837_v45  ;;  %v344_v60 = vrot.slane %v236_v16, %v837_v45 }
  0x16   : > { %688 = vset.pattern.permute.xlu1 %v738_v8  ;;  %690 = vset.pattern.permute.xlu0 %v733_v2 }
  0x17   : > { %334 = vperm.xlu1 %688, %v237_v0   ;;  %370 = vperm.xlu0 %690, %v367_v7  }
  0x1b   : > { %689 = vset.pattern.permute.xlu1 %v739_v9  ;;  %693 = vset.pattern.permute.xlu0 %v734_v3 }
  0x1c   : > { %350 = vperm.xlu1 %689, %v237_v0   ;;  %416 = vperm.xlu0 %693, %v367_v7   ;;  %v356_v0 = vrot.slane %v235_v15, %v840_v56 }
  0x20   : > { %691 = vset.pattern.permute.xlu1 %v735_v4  ;;  %696 = vset.pattern.permute.xlu0 %v738_v8 }
  0x21   : > { %384 = vperm.xlu1 %691, %v367_v7   ;;  %464 = vperm.xlu0 %696, %v367_v7  }
  0x25   : > { %692 = vset.pattern.permute.xlu1 %v732_v1  ;;  %699 = vset.pattern.permute.xlu0 %v733_v2  ;;  %v360_v1 = vrot.slane %v236_v16, %v840_v56 }
  0x26   : > { %400 = vperm.xlu1 %692, %v367_v7  }
  0x2a   : > { %694 = vset.pattern.permute.xlu1 %v736_v5 }
  0x2b   : > { %432 = vperm.xlu1 %694, %v367_v7  }
  0x2f   : > { %695 = vset.pattern.permute.xlu1 %v737_v6 }
  0x30   : > { %448 = vperm.xlu1 %695, %v367_v7  }
  0x34   : > { %697 = vset.pattern.permute.xlu1 %v739_v9 }
  0x35   : > { %480 = vperm.xlu1 %697, %v367_v7  }
  0x39   : > { %698 = vset.pattern.permute.xlu1 %v733_v2 }
  0x3a   : > { %500 = vperm.xlu1 %698, %v497_v10  }
  0x87   : > { %v271_v18 = vpop.permute.xlu1 %270  ;;  %v241_v19 = vpop.permute.xlu0 %240 }
  0x88   : > { %v251_v28 = vmul.f32 %v246_v20, %v241_v19  ;;  %v252_v29 = vmul.f32 %v250_v21, %v241_v19  ;;  %v281_v39 = vmul.f32 %v276_v26, %v271_v18  ;;  %v282_v40 = vmul.f32 %v280_v27, %v271_v18 }
  0x8c   : > { %v287_v30 = vpop.permute.xlu1 %286  ;;  %v255_v31 = vpop.permute.xlu0 %254 }
  0x8d   : > { %v265_v35 = vmul.f32 %v260_v23, %v255_v31  ;;  %v266_v36 = vmul.f32 %v264_v24, %v255_v31  ;;  %v297_v46 = vmul.f32 %v292_v33, %v287_v30  ;;  %v298_v47 = vmul.f32 %v296_v34, %v287_v30 }
  0x8f   : > { %v267_v41 = vadd.f32 %v265_v35, %v251_v28  ;;  %v268_v42 = vadd.f32 %v266_v36, %v252_v29 }
  0x91   : > { %v283_v48 = vadd.f32 %v281_v39, %v267_v41  ;;  %v284_v49 = vadd.f32 %v282_v40, %v268_v42  ;;  %v303_v50 = vpop.permute.xlu1 %302  ;;  %v319_v51 = vpop.permute.xlu0 %318 }
  0x92   : > { %v313_v52 = vmul.f32 %v308_v37, %v303_v50  ;;  %v314_v53 = vmul.f32 %v312_v38, %v303_v50  ;;  %v329_v57 = vmul.f32 %v324_v43, %v319_v51  ;;  %v330_v58 = vmul.f32 %v328_v44, %v319_v51 }
  0x93   : > { %v299_v54 = vadd.f32 %v297_v46, %v283_v48  ;;  %v300_v55 = vadd.f32 %v298_v47, %v284_v49 }
  0x95   : > { %v315_v61 = vadd.f32 %v313_v52, %v299_v54  ;;  %v316_v62 = vadd.f32 %v314_v53, %v300_v55 }
  0x96   : > { %v335_v63 = vpop.permute.xlu1 %334  ;;  %v371_v24 = vpop.permute.xlu0 %370 }
  0x97   : > { %v331_v2 = vadd.f32 %v329_v57, %v315_v61  ;;  %v332_v3 = vadd.f32 %v330_v58, %v316_v62  ;;  %v345_v4 = vmul.f32 %v340_v59, %v335_v63  ;;  %v346_v5 = vmul.f32 %v344_v60, %v335_v63 }
  0x99   : > { %v347_v7 = vadd.f32 %v345_v4, %v331_v2  ;;  %v348_v8 = vadd.f32 %v346_v5, %v332_v3 }
  0x9b   : > { %v351_v6 = vpop.permute.xlu1 %350 }
  0x9c   : > { %v361_v9 = vmul.f32 %v356_v0, %v351_v6  ;;  %v362_v10 = vmul.f32 %v360_v1, %v351_v6 }
  0x9e   : > { %v363_v18 = vadd.f32 %v361_v9, %v347_v7  ;;  %v364_v19 = vadd.f32 %v362_v10, %v348_v8 }
  0xa0   : > { %v365_v20 = vmax.f32 %v363_v18, 0.0  ;;  %v366_v21 = vmax.f32 %v364_v19, 0.0  ;;  %v385_v23 = vpop.permute.xlu1 %384 }
  0xa2   : > { %v376_v26 = vrot.slane %v365_v20, %v807_v13  ;;  %v380_v15 = vrot.slane %v366_v21, %v807_v13  ;;  %v390_v16 = vrot.slane %v365_v20, %v810_v14  ;;  %v394_v27 = vrot.slane %v366_v21, %v810_v14  ;;  %v417_v13 = vpop.permute.xlu0 %416 }
  0xa3   : > { %v422_v30 = vrot.slane %v365_v20, %v818_v22  ;;  %v426_v31 = vrot.slane %v366_v21, %v818_v22  ;;  %v406_v36 = vrot.slane %v365_v20, %v813_v17  ;;  %v410_v37 = vrot.slane %v366_v21, %v813_v17 }
  0xa4   : > { %v381_v28 = vmul.f32 %v376_v26, %v371_v24  ;;  %v382_v29 = vmul.f32 %v380_v15, %v371_v24  ;;  %v395_v33 = vmul.f32 %v390_v16, %v385_v23  ;;  %v396_v34 = vmul.f32 %v394_v27, %v385_v23 }
  0xa5   : > { %v401_v35 = vpop.permute.xlu1 %400  ;;  %v427_v42 = vmul.f32 %v422_v30, %v417_v13  ;;  %v428_v14 = vmul.f32 %v426_v31, %v417_v13  ;;  %v438_v47 = vrot.slane %v365_v20, %v823_v25  ;;  %v442_v22 = vrot.slane %v366_v21, %v823_v25 }
  0xa6   : > { %v397_v38 = vadd.f32 %v395_v33, %v381_v28  ;;  %v398_v39 = vadd.f32 %v396_v34, %v382_v29  ;;  %v411_v40 = vmul.f32 %v406_v36, %v401_v35  ;;  %v412_v41 = vmul.f32 %v410_v37, %v401_v35  ;;  %v465_v55 = vpop.permute.xlu0 %464 }
  0xa7   : > { %v470_v17 = vrot.slane %v365_v20, %v837_v45  ;;  %v474_v52 = vrot.slane %v366_v21, %v837_v45  ;;  %v454_v53 = vrot.slane %v365_v20, %v828_v32  ;;  %v458_v54 = vrot.slane %v366_v21, %v828_v32 }
  0xa8   : > { %v413_v43 = vadd.f32 %v411_v40, %v397_v38  ;;  %v414_v44 = vadd.f32 %v412_v41, %v398_v39  ;;  %v486_v1 = vrot.slane %v365_v20, %v840_v56  ;;  %v490_v2 = vrot.slane %v366_v21, %v840_v56 }
  0xa9   : > { %v475_v62 = vmul.f32 %v470_v17, %v465_v55  ;;  %v476_v25 = vmul.f32 %v474_v52, %v465_v55  ;;  %v740_v13 = vmov 1966171168  }
  0xaa   : > { %v433_v46 = vpop.permute.xlu1 %432  ;;  %v429_v48 = vadd.f32 %v427_v42, %v413_v43  ;;  %v430_v49 = vadd.f32 %v428_v14, %v414_v44  ;;  %v536_v40 = vunpack.c.l.s4 %v740_v13 }
  0xab   : > { %v443_v50 = vmul.f32 %v438_v47, %v433_v46  ;;  %v444_v51 = vmul.f32 %v442_v22, %v433_v46 }
  0xac   : > { %v537_v41 = vunpack.c.0.s8 %v536_v40 }
  0xad   : > { %v445_v58 = vadd.f32 %v443_v50, %v429_v48  ;;  %v446_v59 = vadd.f32 %v444_v51, %v430_v49 }
  0xae   : > { %v540_v14 = vsub.s32 %v537_v41, %v801_v12 }
  0xaf   : > { %v449_v57 = vpop.permute.xlu1 %448 }
  0xb0   : > { %v459_v60 = vmul.f32 %v454_v53, %v449_v57  ;;  %v460_v61 = vmul.f32 %v458_v54, %v449_v57 }
  0xb2   : > { %v461_v63 = vadd.f32 %v459_v60, %v445_v58  ;;  %v462_v0 = vadd.f32 %v460_v61, %v446_v59 }
  0xb4   : > { %v481_v3 = vpop.permute.xlu1 %480  ;;  %v477_v45 = vadd.f32 %v475_v62, %v461_v63  ;;  %v478_v4 = vadd.f32 %v476_v25, %v462_v0 }
  0xb5   : > { %v491_v5 = vmul.f32 %v486_v1, %v481_v3  ;;  %v492_v6 = vmul.f32 %v490_v2, %v481_v3 }
  0xb7   : > { %v493_v32 = vadd.f32 %v491_v5, %v477_v45  ;;  %v494_v7 = vadd.f32 %v492_v6, %v478_v4 }
  0xb9   : > { %v501_v8 = vpop.permute.xlu1 %500  ;;  %v495_v9 = vmax.f32 %v493_v32, 0.0  ;;  %v496_v10 = vmax.f32 %v494_v7, 0.0 }
  0xbb   : > { %v503_v18 = vmul.f32 %v501_v8, %v495_v9  ;;  %v504_v19 = vmul.f32 %v501_v8, %v496_v10 }
  0xbd   : > { %v506_v23 = vsel %vm505_vm0, %v503_v18, 0.0  ;;  %v513_v24 = vsel %vm505_vm0, %v504_v19, 0.0 }
  0xbe   : > { %v507_v26 = vrot.slane %v506_v23, 4  ;;  %v514_v15 = vrot.slane %v513_v24, 4 }
  0xc0   : > { %v508_v20 = vadd.f32 %v507_v26, %v506_v23  ;;  %v515_v16 = vadd.f32 %v514_v15, %v513_v24 }
  0xc2   : > { %v509_v56 = vrot.slane %v508_v20, 2  ;;  %v516_v21 = vrot.slane %v515_v16, 2 }
  0xc4   : > { %v510_v27 = vadd.f32 %v509_v56, %v508_v20  ;;  %v517_v28 = vadd.f32 %v516_v21, %v515_v16 }
  0xc6   : > { %v511_v29 = vrot.slane %v510_v27, 1  ;;  %v518_v30 = vrot.slane %v517_v28, 1 }
  0xc8   : > { %v512_v31 = vadd.f32 %v511_v29, %v510_v27  ;;  %v519_v33 = vadd.f32 %v518_v30, %v517_v28 }
  0xca   : > { %v644_v34 = vmul.f32 -1.442695, %v512_v31  ;;  %v645_v35 = vmul.f32 -1.442695, %v519_v33 }
  0xcc   : > { %700 = vpow2.f32 %v644_v34 }
  0xcd   : > { %702 = vpow2.f32 %v645_v35 }
  0xd6   : > { %v701_v36 = vpop.eup %700 }
  0xd7   : > { %v703_v37 = vpop.eup %702  ;;  %v526_v38 = vadd.f32 1.0, %v701_v36 }
  0xd8   : > { %v527_v39 = vadd.f32 1.0, %v703_v37 }
  0xd9   : > { %704 = vrcp.f32 %v526_v38 }
  0xda   : > { %706 = vrcp.f32 %v527_v39 }
  0xe3   : > { %v705_v42 = vpop.eup %704 }
  0xe4   : > { %v707_v43 = vpop.eup %706 }
  0xe5   : > { %v534_v44 = vcombine.low %v705_v42, %v707_v43 }
  0xe7   : > { %v541_v46 = vrot.slane %v534_v44, %v540_v14 }
  0xe9   : > { %v548_v47 = vrot.slane %v541_v46, %v540_v14 }
  0xeb   : > { %554 = vst.msk [vmem:[%s233_s6] sm:$0x3] %vm552_vm1, %v548_v47 }
  0xec PF: > { %s14_s17 = sadd.s32 1, %s730_s17   ;;  %s882_s15 = smov %s726_s16 }
  0xed   : > { %p11_p5 = scmp.ge.s32.totalorder %s14_s17, 4   ;;  %s883_s16 = smov %s885_s18 }
  0xef   :  { %13 = sbr.rel (!%p11_p5) target bundleno = 2 (0x2), region = 66 }

</bundles_post_ra>
